<compile_context>
chip_gen: v6e
topology: v6e:2x2x1
jax: 0.10.0
libtpu: 0.0.40
codegen_flags: <defaults>
</compile_context>

<pallas_src>
import jax
import jax.numpy as jnp
from jax.experimental import pallas as pl
from jax.experimental.pallas import tpu as pltpu


# A (tr, 2) f32 block pads its lane dim to 128 in VMEM -> 128*4 bytes per row.
_PARAM_ROW_PAD_BYTES = 128 * 4


def _actnorm_kernel(x_ref, p_ref, o_ref):
    # Pure elementwise FMA hot path: out = x * scale + shift.
    # p_ref holds [scale, shift] as two f32 columns; (tr, 1) slices broadcast
    # across the lane axis on the VPU.  Compute in f32, cast only on store.
    scale = p_ref[:, 0:1]
    shift = p_ref[:, 1:2]
    x = x_ref[...].astype(jnp.float32)
    o_ref[...] = (x * scale + shift).astype(o_ref.dtype)


def _physical_vmem_bytes():
    """Best-effort physical VMEM query; conservative (v7x-sized) fallback."""
    try:
        get_info = getattr(pltpu, "get_tpu_info", None)
        if get_info is not None:
            cap = getattr(get_info(), "vmem_capacity_bytes", None)
            if cap:
                return int(cap)
    except Exception:
        pass
    try:
        kind = jax.devices()[0].device_kind.lower()
        if "v5" in kind or "v6" in kind:
            return 128 * 1024 * 1024
    except Exception:
        pass
    return 64 * 1024 * 1024


def _choose_tiles(R, HW, itemsize, pipeline_budget_bytes, sub):
    """Pick (tr, tl) so that 2*x + 2*out + 2*padded-param blocks fit the budget."""
    # Pipelined bytes per row at full-HW lane width.
    per_row = 4 * HW * itemsize + 2 * _PARAM_ROW_PAD_BYTES
    if sub * per_row <= pipeline_budget_bytes:
        # Common path: full-HW lane width (contiguous HBM slab, lane-dense
        # stores, legal for any HW); tile only the row axis.
        tl = HW
        tr = pipeline_budget_bytes // per_row
        tr = max(sub, (tr // sub) * sub)
        if tr >= R:
            if R >= 2 * sub:
                # Cap near R//2 so there are >=2 grid steps: v7x megacore
                # sharding + DMA/compute overlap for mid-size inputs.
                tr = max(sub, ((R // 2) // sub) * sub)
            else:
                tr = R  # tiny input: single full-extent block is fine
    else:
        # Large-H*W fallback: minimum row count, tile the lane axis in
        # 128-multiples so blocks stay bounded and stores stay unmasked.
        tr = R if R < sub else sub
        lane_budget = max(128 * 4 * tr * itemsize,
                          pipeline_budget_bytes - 2 * tr * _PARAM_ROW_PAD_BYTES)
        tl = lane_budget // (4 * tr * itemsize)
        tl = max(128, (tl // 128) * 128)
        if tl >= HW:
            tl = HW
    return tr, tl


def actnorm_forward(x, s, t, logscale_factor=None):
    """ActNorm forward (post-init semantics of flows.ActNorm).

    x : (N, C, H, W)  activations (f32 or bf16), NCHW conv convention
    s : (1, C, 1, 1)  log-scale parameter (kept in f32)
    t : (1, C, 1, 1)  shift parameter (kept in f32)
    """
    N, C, H, W = x.shape
    HW = H * W
    R = N * C

    # ---- parameter glue in plain JAX (tiny, O(C)), kept in float32 ---------
    s32 = s.astype(jnp.float32)
    t32 = t.astype(jnp.float32)
    if logscale_factor is not None:
        s32 = s32 * logscale_factor
    scale = jnp.exp(s32)

    x2d = x.reshape(R, HW)
    scale_rows = jnp.broadcast_to(scale.reshape(1, C), (N, C)).reshape(R, 1)
    shift_rows = jnp.broadcast_to(t32.reshape(1, C), (N, C)).reshape(R, 1)
    params = jnp.concatenate([scale_rows, shift_rows], axis=1)  # (R, 2) f32

    # ---- generation-aware VMEM budgeting ------------------------------------
    itemsize = jnp.dtype(x.dtype).itemsize
    sub = {4: 8, 2: 16, 1: 32}.get(itemsize, 8)  # native sublane packing

    if _physical_vmem_bytes() >= 96 * 1024 * 1024:
        # v5e / v6e: 128 MiB physical VMEM.
        pipeline_budget = 40 * 1024 * 1024      # -> ~10 MiB x-blocks
        vmem_limit = 64 * 1024 * 1024
    else:
        # v7x: 64 MiB physical VMEM (scoped default 32 MiB).
        pipeline_budget = 28 * 1024 * 1024      # -> ~7 MiB x-blocks
        vmem_limit = 44 * 1024 * 1024

    tr, tl = _choose_tiles(R, HW, itemsize, pipeline_budget, sub)
    grid = (pl.cdiv(R, tr), pl.cdiv(HW, tl))

    out2d = pl.pallas_call(
        _actnorm_kernel,
        out_shape=jax.ShapeDtypeStruct((R, HW), x.dtype),
        grid_spec=pltpu.PrefetchScalarGridSpec(
            num_scalar_prefetch=0,
            grid=grid,
            in_specs=[
                pl.BlockSpec((tr, tl), lambda i, j: (i, j)),
                # Param block ignores the lane axis -> stays VMEM-resident
                # across lane tiles (no re-DMA).
                pl.BlockSpec((tr, 2), lambda i, j: (i, 0)),
            ],
            out_specs=pl.BlockSpec((tr, tl), lambda i, j: (i, j)),
        ),
        compiler_params=pltpu.CompilerParams(
            dimension_semantics=("parallel", "parallel"),
            vmem_limit_bytes=vmem_limit,
        ),
    )(x2d, params)

    return out2d.reshape(N, C, H, W)


if __name__ == "__main__":
    # TODO(synk): the original flows.ActNorm performs a one-time data-dependent
    # init of s, t from the first batch; here parameters are initialized
    # deterministically in-script (synthetic kernel), matching the post-init
    # forward semantics out = x * exp(s) + t.
    key = jax.random.PRNGKey(0)
    kx, ks, kt = jax.random.split(key, 3)

    N, C, H, W = 2, 4, 16, 16
    x = jax.random.normal(kx, (N, C, H, W), dtype=jnp.float32)
    s = 0.1 * jax.random.normal(ks, (1, C, 1, 1), dtype=jnp.float32)
    t = 0.1 * jax.random.normal(kt, (1, C, 1, 1), dtype=jnp.float32)

    out = actnorm_forward(x, s, t, logscale_factor=None)
    out = jax.block_until_ready(out)

    # Pure-JAX reference check (same semantics as flows.ActNorm forward).
    ref = x * jnp.exp(s) + t
    assert out.shape == x.shape and out.dtype == x.dtype
    assert jnp.allclose(out, ref, atol=1e-6, rtol=1e-6)

    # Also exercise a bf16 activation path with f32 params (precision-safe FMA).
    xb = x.astype(jnp.bfloat16)
    outb = jax.block_until_ready(actnorm_forward(xb, s, t))
    refb = (xb.astype(jnp.float32) * jnp.exp(s) + t).astype(jnp.bfloat16)
    assert outb.dtype == jnp.bfloat16
    assert jnp.allclose(outb.astype(jnp.float32), refb.astype(jnp.float32),
                        atol=1e-2, rtol=1e-2)

    print("KERNEL_OK")
</pallas_src>

<mosaic_0001>
module attributes {stable_mosaic.version = 11 : i64} {
  func.func @_actnorm_kernel(%arg0: i32, %arg1: i32, %arg2: memref<8x256xf32, #tpu.memory_space<vmem>>, %arg3: memref<8x2xf32, #tpu.memory_space<vmem>>, %arg4: memref<8x256xf32, #tpu.memory_space<vmem>>) attributes {dimension_semantics = [#tpu.dimension_semantics<parallel>, #tpu.dimension_semantics<parallel>], iteration_bounds = array<i64: 1, 1>, scalar_prefetch = 0 : i64, scratch_operands = 0 : i64, tpu.core_type = #tpu.core_type<tc>, window_params = [{transform_indices = @transform_0, window_bounds = array<i64: 8, 256>}, {transform_indices = @transform_1, window_bounds = array<i64: 8, 2>}, {transform_indices = @transform_2, window_bounds = array<i64: 8, 256>}]} {
    %c0 = arith.constant 0 : index
    %c0_0 = arith.constant 0 : index
    %0 = vector.load %arg3[%c0, %c0_0] : memref<8x2xf32, #tpu.memory_space<vmem>>, vector<8x1xf32>
    %c0_1 = arith.constant 0 : index
    %c1 = arith.constant 1 : index
    %1 = vector.load %arg3[%c0_1, %c1] : memref<8x2xf32, #tpu.memory_space<vmem>>, vector<8x1xf32>
    %c0_2 = arith.constant 0 : index
    %c0_3 = arith.constant 0 : index
    %2 = vector.load %arg2[%c0_2, %c0_3] : memref<8x256xf32, #tpu.memory_space<vmem>>, vector<8x256xf32>
    %3 = vector.broadcast %0 : vector<8x1xf32> to vector<8x256xf32>
    %4 = arith.mulf %2, %3 : vector<8x256xf32>
    %5 = vector.broadcast %1 : vector<8x1xf32> to vector<8x256xf32>
    %6 = arith.addf %4, %5 : vector<8x256xf32>
    %c0_4 = arith.constant 0 : index
    %c0_5 = arith.constant 0 : index
    %7 = vector.load %arg4[%c0_4, %c0_5] : memref<8x256xf32, #tpu.memory_space<vmem>>, vector<8x256xf32>
    tpu.vector_store %arg4[%c0_4, %c0_5], %6 {strides = array<i32>} : memref<8x256xf32, #tpu.memory_space<vmem>>, vector<8x256xf32>,
    return
  }
  func.func @transform_0(%arg0: i32, %arg1: i32) -> (i32, i32) {
    %c0_i32 = arith.constant 0 : i32
    return %arg0, %arg1 : i32, i32
  }
  func.func @transform_1(%arg0: i32, %arg1: i32) -> (i32, i32) {
    %c0_i32 = arith.constant 0 : i32
    %c0_i32_0 = arith.constant 0 : i32
    return %arg0, %c0_i32 : i32, i32
  }
  func.func @transform_2(%arg0: i32, %arg1: i32) -> (i32, i32) {
    %c0_i32 = arith.constant 0 : i32
    return %arg0, %arg1 : i32, i32
  }
}

</mosaic_0001>

<bundles_post_ra>
// kernel: tpu_custom_call.1
= control target key start
LH: loop header
LB: loop body
LE: loop exit
PB: predicated region body
PF: predicated region fallthrough
CT: control target
= control target key end

     0   :  { %7 = vsyncpa [#allocation3], 0  ;;  %s135_s0 = inlined_call_operand.hbm [shape: f32[8,256], index: 0, kind: input, shape index: {}]   ;;  %s136_s1 = inlined_call_operand.vmem [shape: f32[8,2], index: 1, kind: input, shape index: {}]   ;;  %s137_s2 = inlined_call_operand.hbm [shape: f32[8,256], index: 2, kind: output, shape index: {}]  }
   0x1   :  { %8 = vsyncpa [#allocation4], 0  ;;  %s107_s9 = smov [#allocation2]  }
   0x2   :  { %s15_s10 = sshll.u32 %s107_s9, 4  ;;  %s16_s10 = int_to_ptr.vmem [resolvable:$true] %s15_s10 }
   0x3   :  { %s71_s11 = scalar_lea.vmem %s16_s10, 256  ;;  %p76_p1 = scmp.lt.s32.totalorder %s16_s10, %s16_s10 }
   0x4   :  { %p72_p0 = scmp.ne.s32.totalorder %s16_s10, %s71_s11  ;;  %p77_p2 = scmp.lt.s32.totalorder %s71_s11, %s71_s11 }
   0x6   :  { %p78_p3 = por %p77_p2, %p76_p1 }
   0x8   :  { %p79_p4 = pnand %p78_p3, %p72_p0 }
   0xa   :  { %82 = shalt.err (!%p79_p4)
}
   0xb   :  { %18 = dma.hbm_to_vmem [thread:$0]  %s135_s0, 256, %s16_s10, [#allocation3]  }
   0xc   :  { %103 = dma.done.wait [#allocation3], 256  }
   0xd   :  { %104 = vsyncadd [#allocation3], 4294967040  ;;  %v108_v0 = vmov 0   ;;  %v24_v1 = vld [vmem:[%s136_s1] sm:$0xff]  ;;  %v109_v2 = vmov 1   ;;  %v26_v5 = vld [vmem:[#allocation2 + $0x8] sm:$0xff] }
   0xe   :  { %61 = vset.pattern.permute.xlu0 %v108_v0  ;;  %v25_v4 = vld [vmem:[#allocation2] sm:$0xff]  ;;  %s110_s16 = smov [#allocation5]  }
   0xf   :  { %29 = vperm.xlu0 %61, %v24_v1   ;;  %s48_s17 = sshll.u32 %s110_s16, 4  ;;  %s49_s17 = int_to_ptr.vmem [resolvable:$true] %s48_s17 }
  0x10   :  { %s83_s0 = scalar_lea.vmem %s49_s17, 256  ;;  %p88_p6 = scmp.lt.s32.totalorder %s49_s17, %s49_s17 }
  0x11   :  { %p84_p5 = scmp.ne.s32.totalorder %s49_s17, %s83_s0  ;;  %p89_p7 = scmp.lt.s32.totalorder %s83_s0, %s83_s0 }
  0x13   :  { %62 = vset.pattern.permute.xlu0 %v109_v2  ;;  %p90_p8 = por %p89_p7, %p88_p6 }
  0x14   :  { %35 = vperm.xlu0 %62, %v24_v1  }
  0x15   :  { %p91_p9 = pnand %p90_p8, %p84_p5 }
  0x8a   :  { %v30_v3 = vpop.permute.xlu0 %29 }
  0x8b   :  { %v32_v6 = vmul.f32 %v30_v3, %v25_v4  ;;  %v33_v7 = vmul.f32 %v30_v3, %v26_v5 }
  0x8f   :  { %v36_v8 = vpop.permute.xlu0 %35 }
  0x90   :  { %v38_v9 = vadd.f32 %v36_v8, %v32_v6  ;;  %v39_v10 = vadd.f32 %v36_v8, %v33_v7 }
  0x92   :  { %40 = vst [vmem:[#allocation5] sm:$0xff] %v38_v9  ;;  %41 = vst [vmem:[#allocation5 + $0x8] sm:$0xff] %v39_v10 }
  0x93   :  { %94 = shalt.err (!%p91_p9)
}
  0x94   :  { %51 = dma.vmem_to_hbm [thread:$0]  %s49_s17, 256, %s137_s2, [#allocation4]  }
  0x95   :  { %105 = dma.done.wait [#allocation4], 256  }
  0x96   :  { %106 = vsyncadd [#allocation4], 4294967040 }
  0x97   :  { %55 = vsyncpa [#allocation3], 1 }
  0x98   :  { %56 = vsyncpa [#allocation4], 1 }

</bundles_post_ra>
